<compile_context>
chip_gen: v6e
topology: v6e:2x2x1
jax: 0.10.0
libtpu: 0.0.40
codegen_flags: <defaults>
</compile_context>

<pallas_src>
import functools

import jax
import jax.numpy as jnp
from jax.experimental import pallas as pl
from jax.experimental.pallas import tpu as pltpu

_MIB = 1024 * 1024


# ---------------------------------------------------------------------------
# Kernels: channel shuffle as `groups` dense sub-block copies.
# ---------------------------------------------------------------------------
def _shuffle_kernel_5d(x_ref, o_ref, *, groups: int):
    # x_ref: (1, groups, q_block, s_block, 128)
    # o_ref: (1, q_block, groups, s_block, 128)
    for g in range(groups):
        o_ref[0, :, g, :, :] = x_ref[0, g, :, :, :]


def _shuffle_kernel_4d(x_ref, o_ref, *, groups: int):
    # x_ref: (1, groups, q_block, hw_block)
    # o_ref: (1, q_block, groups, hw_block)
    for g in range(groups):
        o_ref[0, :, g, :] = x_ref[0, g, :, :]


# ---------------------------------------------------------------------------
# Host-side sizing helpers (pure Python ints).
# ---------------------------------------------------------------------------
def _round_up(x: int, m: int) -> int:
    return ((x + m - 1) // m) * m


def _round_down(x: int, m: int) -> int:
    return (x // m) * m


def _sublane_unit(itemsize: int) -> int:
    # f32 -> 8, bf16 -> 16, int8/fp8 -> 32 sublanes per native VMEM tile.
    return max(8, 32 // max(1, itemsize))


def _padded_block_bytes(block_shape, itemsize: int) -> int:
    # Real VMEM footprint: last two dims are padded to the (sublane, 128) tile.
    sub = _sublane_unit(itemsize)
    lead = 1
    for d in block_shape[:-2]:
        lead *= int(d)
    return lead * _round_up(int(block_shape[-2]), sub) * \
        _round_up(int(block_shape[-1]), 128) * itemsize


def _pick_block(extent: int, cap: int, unit: int) -> int:
    """Largest block <= cap along an axis that is a multiple of `unit` or the
    full extent (Mosaic's constraint for the tiled trailing dims)."""
    cap = max(1, cap)
    if extent <= cap:
        return extent
    return min(extent, max(unit, _round_down(cap, unit)))


def _vmem_info():
    try:
        info = pltpu.get_tpu_info()
        return int(getattr(info, "vmem_capacity_bytes", 64 * _MIB))
    except Exception:
        return 64 * _MIB  # conservative: v7x per-TensorCore VMEM


def _target_block_bytes(vmem_bytes: int) -> int:
    # v7x (64 MiB VMEM, 3.2 TB/s HBM): bigger blocks amortize the ~0.35 us/step
    # pipeline overhead; 2*(in+out) double-buffered still fits with headroom.
    # v5e/v6e (128 MiB VMEM): 8 MiB blocks are already at the HBM roofline.
    if vmem_bytes <= 64 * _MIB:
        return 10 * _MIB
    return 8 * _MIB


# ---------------------------------------------------------------------------
# Public entry point.
# ---------------------------------------------------------------------------
def channel_shuffle(x: jax.Array, groups: int) -> jax.Array:
    n, c, h, w = x.shape
    assert c % groups == 0, "channels must be divisible by groups"
    cpg = c // groups
    hw = h * w
    itemsize = jnp.dtype(x.dtype).itemsize
    sub = _sublane_unit(itemsize)

    vmem_bytes = _vmem_info()
    target = _target_block_bytes(vmem_bytes)
    vmem_cap = max(24 * _MIB, vmem_bytes - 16 * _MIB)

    lane_dense = (hw % 128 == 0)

    if lane_dense:
        # ---- Main path: trailing (hw_outer, 128) is fully lane/sublane dense.
        lane = 128
        s_extent = hw // 128
        s_unit = sub          # s sits on the sublane axis of the trailing pair
        q_unit = 1            # q is a middle dim: no layout constraint
        lane_factor = 128
        x_view = x.reshape(n, groups, cpg, s_extent, lane)
        out_view_shape = (n, cpg, groups, s_extent, lane)

        def in_block(qb, sb):
            return (1, groups, qb, sb, lane)

        def out_block(qb, sb):
            return (1, qb, groups, sb, lane)

        in_index_map = lambda ni, qi, si: (ni, 0, qi, si, 0)
        out_index_map = lambda ni, qi, si: (ni, qi, 0, si, 0)
        kernel = functools.partial(_shuffle_kernel_5d, groups=groups)
    else:
        # ---- Fallback (hw not a multiple of 128): hw stays flat on the lane
        # axis and is blocked in multiples of 128 (tail block masked by Pallas);
        # channels-per-group provide sublane density on the input side.
        s_extent = hw
        s_unit = 128 if hw >= 128 else hw
        q_unit = sub if cpg >= sub else cpg
        lane_factor = 1
        x_view = x.reshape(n, groups, cpg, hw)
        out_view_shape = (n, cpg, groups, hw)

        def in_block(qb, sb):
            return (1, groups, qb, sb)

        def out_block(qb, sb):
            return (1, qb, groups, sb)

        in_index_map = lambda ni, qi, si: (ni, 0, qi, si)
        out_index_map = lambda ni, qi, si: (ni, qi, 0, si)
        kernel = functools.partial(_shuffle_kernel_4d, groups=groups)

    # ---- Initial block sizes targeting ~`target` bytes per block ------------
    row_bytes = groups * hw * itemsize           # one q-slice, full spatial
    if row_bytes <= target:
        q_block = _pick_block(cpg, max(1, target // row_bytes), q_unit)
        s_block = s_extent
    else:
        # A single q-slice already exceeds the budget: block the spatial axis.
        q_block = min(cpg, q_unit)
        per_s = groups * q_block * lane_factor * itemsize
        s_block = _pick_block(s_extent, max(1, target // per_s), s_unit)

    def shrink(qb, sb):
        # Shrink the channel-block axis first, then spatial; always keep the
        # layout constraints (multiple of unit, or full extent) intact.
        if qb > q_unit:
            return max(q_unit, _round_down(qb // 2, q_unit)), sb
        if sb > s_unit:
            return qb, max(s_unit, _round_down(sb // 2, s_unit))
        return qb, sb

    def vmem_need(qb, sb):
        pin = _padded_block_bytes(in_block(qb, sb), itemsize)
        pout = _padded_block_bytes(out_block(qb, sb), itemsize)
        return 2 * (pin + pout) + 2 * _MIB    # double-buffered in + out + slack

    # ---- Fit double-buffered (8,128)-padded blocks into VMEM ---------------
    while vmem_need(q_block, s_block) > vmem_cap:
        nqb, nsb = shrink(q_block, s_block)
        if (nqb, nsb) == (q_block, s_block):
            break
        q_block, s_block = nqb, nsb

    # ---- Ensure enough grid steps for v7x's two TensorCores / DMA overlap --
    total_bytes = x.size * itemsize
    min_steps = 4
    if total_bytes >= 4 * _MIB:
        while n * pl.cdiv(cpg, q_block) * pl.cdiv(s_extent, s_block) < min_steps:
            nqb, nsb = shrink(q_block, s_block)
            if (nqb, nsb) == (q_block, s_block):
                break
            q_block, s_block = nqb, nsb

    grid = (n, pl.cdiv(cpg, q_block), pl.cdiv(s_extent, s_block))
    vmem_limit = int(max(16 * _MIB, min(vmem_need(q_block, s_block), vmem_cap)))

    out_view = pl.pallas_call(
        kernel,
        out_shape=jax.ShapeDtypeStruct(out_view_shape, x.dtype),
        grid_spec=pltpu.PrefetchScalarGridSpec(
            num_scalar_prefetch=0,
            grid=grid,
            in_specs=[pl.BlockSpec(in_block(q_block, s_block), in_index_map)],
            out_specs=pl.BlockSpec(out_block(q_block, s_block), out_index_map),
        ),
        compiler_params=pltpu.CompilerParams(
            dimension_semantics=("parallel", "parallel", "parallel"),
            vmem_limit_bytes=vmem_limit,
        ),
    )(x_view)

    return out_view.reshape(n, c, h, w)


def channel_shuffle_ref(x: jax.Array, groups: int) -> jax.Array:
    # Pure-JAX reference mirroring the PyTorch forward exactly.
    n, c, h, w = x.shape
    y = x.reshape(n, groups, c // groups, h, w)
    y = jnp.transpose(y, (0, 2, 1, 3, 4))
    return y.reshape(n, c, h, w)


if __name__ == "__main__":
    key = jax.random.PRNGKey(0)

    # Primary case (lane-dense main path: H*W multiple of 128).
    N, C, H, W = 2, 4, 16, 16
    groups = 2
    x = jax.random.normal(key, (N, C, H, W), dtype=jnp.float32)
    out = jax.block_until_ready(channel_shuffle(x, groups))
    ref = channel_shuffle_ref(x, groups)
    assert out.shape == (N, C, H, W)
    assert out.dtype == x.dtype
    assert jnp.array_equal(out, ref), "mismatch (lane-dense path)"

    # Fallback path: hw < 128 (hw flat on the lane axis).
    x2 = jax.random.normal(jax.random.PRNGKey(1), (2, 8, 8, 8), dtype=jnp.float32)
    out2 = jax.block_until_ready(channel_shuffle(x2, 4))
    assert jnp.array_equal(out2, channel_shuffle_ref(x2, 4)), "mismatch (hw<128 fallback)"

    # Fallback path: hw >= 128 but not a multiple of 128.
    x3 = jax.random.normal(jax.random.PRNGKey(2), (1, 6, 10, 20), dtype=jnp.float32)
    out3 = jax.block_until_ready(channel_shuffle(x3, 3))
    assert jnp.array_equal(out3, channel_shuffle_ref(x3, 3)), "mismatch (hw%128 fallback)"

    print("KERNEL_OK")
</pallas_src>

<mosaic_0001>
module attributes {stable_mosaic.version = 11 : i64} {
  func.func @_shuffle_kernel_5d(%arg0: i32, %arg1: i32, %arg2: i32, %arg3: memref<1x2x2x2x128xf32, #tpu.memory_space<vmem>>, %arg4: memref<1x2x2x2x128xf32, #tpu.memory_space<vmem>>) attributes {dimension_semantics = [#tpu.dimension_semantics<parallel>, #tpu.dimension_semantics<parallel>, #tpu.dimension_semantics<parallel>], iteration_bounds = array<i64: 2, 1, 1>, scalar_prefetch = 0 : i64, scratch_operands = 0 : i64, tpu.core_type = #tpu.core_type<tc>, window_params = [{transform_indices = @transform_0, window_bounds = array<i64: 1, 2, 2, 2, 128>}, {transform_indices = @transform_1, window_bounds = array<i64: 1, 2, 2, 2, 128>}]} {
    %c0 = arith.constant 0 : index
    %c0_0 = arith.constant 0 : index
    %c0_1 = arith.constant 0 : index
    %c0_2 = arith.constant 0 : index
    %c0_3 = arith.constant 0 : index
    %0 = vector.load %arg3[%c0, %c0_0, %c0_1, %c0_2, %c0_3] : memref<1x2x2x2x128xf32, #tpu.memory_space<vmem>>, vector<1x1x2x2x128xf32>
    %1 = vector.shape_cast %0 : vector<1x1x2x2x128xf32> to vector<2x2x128xf32>
    %c0_4 = arith.constant 0 : index
    %c0_5 = arith.constant 0 : index
    %c0_6 = arith.constant 0 : index
    %c0_7 = arith.constant 0 : index
    %c0_8 = arith.constant 0 : index
    %2 = vector.load %arg4[%c0_4, %c0_5, %c0_6, %c0_7, %c0_8] : memref<1x2x2x2x128xf32, #tpu.memory_space<vmem>>, vector<1x2x1x2x128xf32>
    %3 = vector.shape_cast %2 : vector<1x2x1x2x128xf32> to vector<2x2x128xf32>
    %4 = vector.shape_cast %1 : vector<2x2x128xf32> to vector<1x2x1x2x128xf32>
    tpu.vector_store %arg4[%c0_4, %c0_5, %c0_6, %c0_7, %c0_8], %4 {strides = array<i32>} : memref<1x2x2x2x128xf32, #tpu.memory_space<vmem>>, vector<1x2x1x2x128xf32>,
    %c0_9 = arith.constant 0 : index
    %c1 = arith.constant 1 : index
    %c0_10 = arith.constant 0 : index
    %c0_11 = arith.constant 0 : index
    %c0_12 = arith.constant 0 : index
    %5 = vector.load %arg3[%c0_9, %c1, %c0_10, %c0_11, %c0_12] : memref<1x2x2x2x128xf32, #tpu.memory_space<vmem>>, vector<1x1x2x2x128xf32>
    %6 = vector.shape_cast %5 : vector<1x1x2x2x128xf32> to vector<2x2x128xf32>
    %c0_13 = arith.constant 0 : index
    %c0_14 = arith.constant 0 : index
    %c1_15 = arith.constant 1 : index
    %c0_16 = arith.constant 0 : index
    %c0_17 = arith.constant 0 : index
    %7 = vector.load %arg4[%c0_13, %c0_14, %c1_15, %c0_16, %c0_17] : memref<1x2x2x2x128xf32, #tpu.memory_space<vmem>>, vector<1x2x1x2x128xf32>
    %8 = vector.shape_cast %7 : vector<1x2x1x2x128xf32> to vector<2x2x128xf32>
    %9 = vector.shape_cast %6 : vector<2x2x128xf32> to vector<1x2x1x2x128xf32>
    tpu.vector_store %arg4[%c0_13, %c0_14, %c1_15, %c0_16, %c0_17], %9 {strides = array<i32>} : memref<1x2x2x2x128xf32, #tpu.memory_space<vmem>>, vector<1x2x1x2x128xf32>,
    return
  }
  func.func @transform_0(%arg0: i32, %arg1: i32, %arg2: i32) -> (i32, i32, i32, i32, i32) {
    %c0_i32 = arith.constant 0 : i32
    %c0_i32_0 = arith.constant 0 : i32
    %c0_i32_1 = arith.constant 0 : i32
    return %arg0, %c0_i32, %arg1, %arg2, %c0_i32_0 : i32, i32, i32, i32, i32
  }
  func.func @transform_1(%arg0: i32, %arg1: i32, %arg2: i32) -> (i32, i32, i32, i32, i32) {
    %c0_i32 = arith.constant 0 : i32
    %c0_i32_0 = arith.constant 0 : i32
    %c0_i32_1 = arith.constant 0 : i32
    return %arg0, %arg1, %c0_i32, %arg2, %c0_i32_0 : i32, i32, i32, i32, i32
  }
}

</mosaic_0001>

<bundles_post_ra>
// kernel: tpu_custom_call.1
= control target key start
LH: loop header
LB: loop body
LE: loop exit
PB: predicated region body
PF: predicated region fallthrough
CT: control target
= control target key end

     0   :  { %6 = vsyncpa [#allocation3], 0  ;;  %s646_s0 = inlined_call_operand.hbm [shape: f32[2,2,2,2,128], index: 0, kind: input, shape index: {}]   ;;  %s647_s1 = inlined_call_operand.hbm [shape: f32[2,2,2,2,128], index: 1, kind: output, shape index: {}]  }
   0x1   :  { %8 = vsyncpa [#allocation3 + $0x1], 0 }
   0x2   :  { %9 = vsyncpa [#allocation4], 0 }
   0x3   :  { %11 = vsyncpa [#allocation4 + $0x1], 0  ;;  %s500_s6 = smov 0   ;;  %s502_s7 = smov 0  }
   0x4   :  { %s504_s8 = smov 0   ;;  %s506_s9 = smov 0  }
   0x5   :  { %s508_s10 = smov 0   ;;  %s510_s11 = smov 0  }
   0x6 LB: > { %s287_s12 = sadd.s32 4294967295, %s482_s11   ;;  %s288_s13 = sadd.s32 4294967294, %s482_s11   ;;  %s482_s11 = sphi %s510_s11, %s17_s11   ;;  %s478_s10 = sphi %s508_s10, %s658_s10   ;;  %s474_s9 = sphi %s506_s9, %s657_s9   ;;  %s470_s8 = sphi %s504_s8, %s656_s8   ;;  %s466_s7 = sphi %s502_s7, %s655_s7   ;;  %s462_s6 = sphi %s500_s6, %s654_s6  }
   0x7   : > { %s36_s14 = sadd.s32 1, %s478_s10  ;;  %s47_s15 = sadd.s32 1, %s470_s8 }
   0x8   : > { %p38_p0 = scmp.ge.s32.totalorder %s36_s14, 2  ;;  %p54_p1 = scmp.ne.s32.totalorder %s470_s8, %s466_s7 }
   0x9   : > { %p55_p2 = scmp.eq.s32.totalorder %s482_s11, 0  ;;  %p60_p3 = scmp.ne.s32.totalorder %s466_s7, %s462_s6 }
   0xa   : > { %s660_s14 = smov (%p38_p0, %s36_s14), 0  ;;  %p61_p5 = scmp.eq.s32.totalorder %s287_s12, 0 }
   0xb   : > { %p541_p4 = por %p55_p2, %p54_p1  ;;  %s40_s17 = ssub.s32 %s478_s10, %s660_s14 }
   0xc   : > { %p88_p6 = scmp.eq.s32.totalorder %s287_s12, 1  ;;  %p45_p7 = scmp.eq.s32.totalorder %s40_s17, 0 }
   0xd   : > { %p547_p8 = por %p61_p5, %p60_p3  ;;  %p94_p10 = scmp.eq.s32.totalorder %s288_s13, 1 }
   0xe   : > { %p551_p9 = por %p88_p6, %p54_p1  ;;  %p320_p13 = scmp.lt.s32.totalorder %s482_s11, 2 }
   0xf   : > { %s556_s20 = scalar_select %p45_p7, %s470_s8, %s47_s15  }
  0x10   : > { %p558_p11 = por %p94_p10, %p60_p3  ;;  %s114_s22 = sand.u32 1, %s470_s8  }
  0x11   : > { %s291_s23 = sshll.u32 %s114_s22, 3  ;;  %s306_s24 = sshll.u32 %s478_s10, 7 }
  0x12   : > { %s127_s27 = scalar_lea.hbm %s646_s0, %s306_s24  ;;  %s118_s28 = scalar_lea.vmem [#allocation2], %s291_s23 }
  0x13   : > { %s128_s29 = sshll.u32 %s118_s28, 4  ;;  %p571_p0 = pnand %p320_p13, %p541_p4  ;;  %s129_s29 = int_to_ptr.vmem [resolvable:$true] %s128_s29 }
  0x14   : > { %p294_p1 = scmp.ge.s32.totalorder %s482_s11, 1  ;;  %s115_s2 = scalar_lea.sflag [#allocation3], %s114_s22 }
  0x15   : > { %p376_p2 = pneg %p571_p0  ;;  %s387_s3 = scalar_lea.vmem %s129_s29, 128 }
  0x16   : > { %p388_p3 = scmp.ne.s32.totalorder %s129_s29, %s387_s3  ;;  %s484_s4 = smov [#allocation2]  }
  0x17   : > { %s392_s5 = sshll.u32 %s484_s4, 4  ;;  %s393_s5 = int_to_ptr.vmem [resolvable:$false] %s392_s5 }
  0x18   : > { %p390_p5 = pnand %p388_p3, %p376_p2  ;;  %s394_s12 = scalar_lea.vmem %s393_s5, 256 }
  0x19   : > { %p395_p7 = scmp.lt.s32.totalorder %s129_s29, %s393_s5  ;;  %p396_p10 = scmp.lt.s32.totalorder %s394_s12, %s387_s3 }
  0x1a   : > { %p391_p6 = pneg %p390_p5 }
  0x1b   : > { %p397_p12 = por %p396_p10, %p395_p7 }
  0x1d   : > { %p398_p4 = pnand %p397_p12, %p391_p6 }
  0x1f   : > { %401 = shalt.err (!%p398_p4)
}
  0x20   : > { %s485_s13 = smov 32   ;;  %s486_s15 = smov 2  }
  0x21   : > { %315 = dma.hbm_to_vmem [thread:$0]  (!%p571_p0), %s127_s27, 128, %s129_s29, %s115_s2, %s485_s13, %s485_s13, %s486_s15  }
  0x22   : > { %p136_p13 = scmp.lt.s32.totalorder %s482_s11, 3 }
  0x24   : > { %p137_p2 = pnand %p294_p1, %p136_p13 }
  0x25   : > { %s584_s16 = sand.u32 (!%p137_p2), 1, %s466_s7  }
  0x26   : > { %140 = sbr.rel (%p137_p2) target bundleno = 70 (0x46), region = 24  ;;  %s295_s17 = sshll.u32 (!%p137_p2), %s584_s16, 3 }
  0x27   : > { %s143_s22 = scalar_lea.sflag (!%p137_p2), [#allocation3], %s584_s16  ;;  %s146_s23 = scalar_lea.vmem (!%p137_p2), [#allocation2], %s295_s17 }
  0x2b   : > { %453 = dma.done.wait (%p547_p8), %s143_s22, 128  }
  0x2c   : > { %455 = vsyncadd (%p547_p8), %s143_s22, 4294967168  ;;  %s164_s24 = scalar_lea.vmem [#allocation5], %s295_s17  ;;  %s307_s26 = sshll.u32 %s474_s9, 7  ;;  %v167_v0 = vld [vmem:[%s146_s23] sm:$0x3] }
  0x2d   : > { %s195_s25 = sshll.u32 %s164_s24, 4  ;;  %v168_v1 = vld [vmem:[%s146_s23 + $0x2] sm:$0x3]  ;;  %v297_v2 = vld [vmem:[%s146_s23 + $0x4] sm:$0x3]  ;;  %s598_s29 = scalar_lea.hbm %s647_s1, %s307_s26  ;;  %169 = vst [vmem:[%s164_s24] sm:$0x3] %v167_v0  ;;  %s593_s25 = int_to_ptr.vmem [resolvable:$true] %s195_s25 }
  0x2e   : > { %170 = vst [vmem:[%s164_s24 + $0x4] sm:$0x3] %v168_v1  ;;  %299 = vst [vmem:[%s164_s24 + $0x2] sm:$0x3] %v297_v2  ;;  %v298_v3 = vld [vmem:[%s146_s23 + $0x6] sm:$0x3] }
  0x2f   : > { %300 = vst [vmem:[%s164_s24 + $0x6] sm:$0x3] %v298_v3  ;;  %s178_s18 = scalar_lea.sflag [#allocation4], %s584_s16  ;;  %s402_s9 = scalar_lea.vmem %s593_s25, 128 }
  0x30   : > { %p403_p8 = scmp.ne.s32.totalorder %s593_s25, %s402_s9  ;;  %s487_s30 = smov [#allocation5]  }
  0x31   : > { %s406_s2 = sshll.u32 %s487_s30, 4  ;;  %s407_s2 = int_to_ptr.vmem [resolvable:$false] %s406_s2 }
  0x32   : > { %p404_p12 = pnand %p403_p8, %p551_p9  ;;  %s408_s3 = scalar_lea.vmem %s407_s2, 256 }
  0x33   : > { %p409_p1 = scmp.lt.s32.totalorder %s593_s25, %s407_s2  ;;  %p410_p3 = scmp.lt.s32.totalorder %s408_s3, %s402_s9 }
  0x34   : > { %p405_p0 = pneg %p404_p12 }
  0x35   : > { %p411_p5 = por %p410_p3, %p409_p1 }
  0x37   : > { %p412_p6 = pnand %p411_p5, %p405_p0 }
  0x39   : > { %415 = shalt.err (!%p412_p6)
}
  0x3a   : > { %s416_s4 = scalar_lea.hbm %s598_s29, 128  ;;  %s420_s13 = scalar_lea.hbm %s647_s1, 256 }
  0x3b   : > { %p417_p7 = scmp.ne.s32.totalorder %s598_s29, %s416_s4  ;;  %p421_p13 = scmp.lt.s32.totalorder %s598_s29, %s647_s1 }
  0x3c   : > { %p422_p2 = scmp.lt.s32.totalorder %s420_s13, %s416_s4 }
  0x3d   : > { %p418_p10 = pnand %p417_p7, %p551_p9 }
  0x3e   : > { %p423_p8 = por %p422_p2, %p421_p13 }
  0x3f   : > { %p419_p4 = pneg %p418_p10 }
  0x41   : > { %p424_p12 = pnand %p423_p8, %p419_p4 }
  0x43   : > { %427 = shalt.err (!%p424_p12)
}
  0x44   : > { %s488_s22 = smov 32   ;;  %s489_s23 = smov 2  }
  0x45   : > { %310 = dma.vmem_to_hbm [thread:$0]  (%p551_p9), %s593_s25, 128, %s598_s29, %s178_s18, %s488_s22, %s488_s22, %s489_s23  }
  0x46 PF: > { %s210_s24 = sand.u32 1, %s462_s6   ;;  %p653_p0 = scmp.ge.s32.totalorder %s482_s11, 2 }
  0x47   : > { %s211_s26 = scalar_lea.sflag [#allocation4], %s210_s24 }
  0x48   : > { %p317_p1 = pnand %p653_p0, %p558_p11 }
  0x4a   : > { %p318_p3 = pneg %p317_p1 }
  0x4c   : > { %457 = dma.done.wait (%p318_p3), %s211_s26, 128  }
  0x4d   : > { %459 = vsyncadd (%p318_p3), %s211_s26, 4294967168  ;;  %s17_s11 = sadd.s32 1, %s482_s11   ;;  %s654_s6 = smov %s466_s7 }
  0x4e   : > { %p14_p5 = scmp.ge.s32.totalorder %s17_s11, 4   ;;  %s655_s7 = smov %s470_s8 }
  0x4f   : > { %s656_s8 = smov %s556_s20  ;;  %s657_s9 = smov %s478_s10 }
  0x50   : > { %s658_s10 = smov %s660_s14  ;;  %16 = sbr.rel (!%p14_p5) target bundleno = 6 (0x6), region = 71 }
  0x55   :  { %216 = vsyncpa [#allocation3], 1 }
  0x56   :  { %218 = vsyncpa [#allocation3 + $0x1], 1 }
  0x57   :  { %219 = vsyncpa [#allocation4], 1 }
  0x58   :  { %221 = vsyncpa [#allocation4 + $0x1], 1 }

</bundles_post_ra>
